<compile_context>
chip_gen: v7x
topology: tpu7x:2x2x1
jax: 0.10.0
libtpu: 0.0.40
codegen_flags: <defaults>
</compile_context>

<pallas_src>
import functools

import jax
import jax.numpy as jnp
from jax.experimental import pallas as pl
from jax.experimental.pallas import tpu as pltpu

PACK = 8               # rows packed per MXU column (K = PACK*F = 128)
ROW_TILE_MAX = 32768   # rows per grid step


def _round_up(n, m):
    return ((n + m - 1) // m) * m


def _cdiv(a, b):
    return -(-a // b)


def mlp_kernel(x_ref, w1_ref, b1_ref, w2_ref, b2_ref, out_ref, *, pack, nclasses):
    """One row-block of the MLP in packed row-major layout.

    x_ref:   (TNp, pack*F)  f32   8 rows packed per packed-row (free reshape of x)
    w1_ref:  (pack*F, pack*H) bf16  block-diagonal W1^T, VMEM-resident
    b1_ref:  (1, pack*H)    f32
    w2_ref:  (pack*H, pack*C) bf16  block-diagonal W2^T (row-major output order)
    b2_ref:  (1, pack*C)    f32
    out_ref: (TNp, pack*C)  f32   packed log_softmax rows (lane = r*C + c)
    """
    # Cast to bf16 on the VPU (keeps the wrapper free of an extra HBM cast pass).
    x = x_ref[...].astype(jnp.bfloat16)

    # Layer 1 (packed): h[:, r*H+j] = sum_f x[:, r*F+f] * W1[j, f]  -- one MXU tile.
    h = jnp.dot(x, w1_ref[...], preferred_element_type=jnp.float32)
    h = jnp.maximum(h + b1_ref[...], 0.0)

    # TODO(synk): Dropout(p=0.6) is eval-mode identity here; training-mode masking
    # (pltpu.prng_random_bits) is not implemented.

    # Layer 2 (packed, block-diagonal): logits[:, r*C+c] = sum_j h[:, r*H+j]*W2[c, j].
    logits = jnp.dot(h.astype(jnp.bfloat16), w2_ref[...],
                     preferred_element_type=jnp.float32)
    logits = logits + b2_ref[...]

    # Exact segmented log_softmax: each packed row holds `pack` independent rows,
    # each occupying `nclasses` adjacent lanes.  All f32; tiny VPU/XLU work.
    C = nclasses
    outs = []
    for r in range(pack):
        g = logits[:, r * C:(r + 1) * C]
        m = jnp.max(g, axis=-1, keepdims=True)
        ex = jnp.exp(g - m)
        lse = m + jnp.log(jnp.sum(ex, axis=-1, keepdims=True))
        outs.append(g - lse)
    out_ref[...] = jnp.concatenate(outs, axis=-1).astype(out_ref.dtype)


def mlp_forward(x, w1, b1, w2, b2, *, row_tile_max=ROW_TILE_MAX):
    """x: [N, F] f32; w1: [H, F]; b1: [H]; w2: [C, H]; b2: [C]  (torch layouts).
    Returns [N, C] f32 log-probabilities.  `edg` of the torch forward is unused."""
    N, F = x.shape
    H = w1.shape[0]
    C = w2.shape[0]
    P = PACK

    # ---- row tiling -----------------------------------------------------------
    n_rows = _round_up(N, P)
    n_steps = max(1, _cdiv(n_rows, row_tile_max))
    if n_steps == 1 and n_rows >= 2 * 64 * P:
        n_steps = 2  # v7x megacore: keep >= 2 grid steps when there is enough work
    if n_steps == 1:
        tile_rows = n_rows                                # single block == full array
    else:
        tile_rows = _round_up(_cdiv(n_rows, n_steps), 64)  # packed-row dim multiple of 8
    n_pad = tile_rows * n_steps
    tnp = tile_rows // P                                  # packed rows per block

    # ---- free layout plumbing (no transpose / cast HBM passes) ----------------
    if n_pad != N:
        x = jnp.pad(x, ((0, n_pad - N), (0, 0)))
    x_packed = x.reshape(n_pad // P, P * F)               # row-major reshape: free

    eye = jnp.eye(P, dtype=w1.dtype)
    # w1bd[r*F+f, r*H+j] = W1[j, f];  w2bd[r*H+j, r*C+c] = W2[c, j]
    w1bd = jnp.einsum('rs,jf->rfsj', eye, w1).reshape(P * F, P * H).astype(jnp.bfloat16)
    w2bd = jnp.einsum('rs,cj->rjsc', eye, w2).reshape(P * H, P * C).astype(jnp.bfloat16)
    b1t = jnp.tile(b1.astype(jnp.float32), P).reshape(1, P * H)
    b2t = jnp.tile(b2.astype(jnp.float32), P).reshape(1, P * C)

    kernel = functools.partial(mlp_kernel, pack=P, nclasses=C)
    out_packed = pl.pallas_call(
        kernel,
        out_shape=jax.ShapeDtypeStruct((n_pad // P, P * C), jnp.float32),
        grid=(n_steps,),
        in_specs=[
            pl.BlockSpec((tnp, P * F), lambda i: (i, 0)),    # packed rows: streamed
            pl.BlockSpec((P * F, P * H), lambda i: (0, 0)),  # weights/biases: resident
            pl.BlockSpec((1, P * H), lambda i: (0, 0)),
            pl.BlockSpec((P * H, P * C), lambda i: (0, 0)),
            pl.BlockSpec((1, P * C), lambda i: (0, 0)),
        ],
        out_specs=pl.BlockSpec((tnp, P * C), lambda i: (i, 0)),
        compiler_params=pltpu.CompilerParams(
            dimension_semantics=("parallel",),   # shard row blocks across TCs (v7x)
            vmem_limit_bytes=32 * 1024 * 1024,
        ),
    )(x_packed, w1bd, b1t, w2bd, b2t)

    out = out_packed.reshape(n_pad, C)                     # row-major reshape: free
    return out[:N] if n_pad != N else out


if __name__ == "__main__":
    # Shapes implied by the module: num_features=16, hidden_channels=32, nclasses=4.
    N, F, H, C = 8, 16, 32, 4

    key = jax.random.PRNGKey(0)
    kx, kw1, kb1, kw2, kb2 = jax.random.split(key, 5)

    x = jax.random.normal(kx, (N, F), dtype=jnp.float32)
    w1 = jax.random.normal(kw1, (H, F), dtype=jnp.float32) * 0.1   # torch (out, in)
    b1 = jax.random.normal(kb1, (H,), dtype=jnp.float32) * 0.1
    w2 = jax.random.normal(kw2, (C, H), dtype=jnp.float32) * 0.1
    b2 = jax.random.normal(kb2, (C,), dtype=jnp.float32) * 0.1

    out = jax.block_until_ready(mlp_forward(x, w1, b1, w2, b2))

    # Reference (eval-mode dropout = identity), matching the kernel's
    # bf16-operand / f32-accumulate MXU numerics.
    def bf(a):
        return a.astype(jnp.bfloat16)

    h_ref = jnp.maximum(
        jnp.dot(bf(x), bf(w1).T, preferred_element_type=jnp.float32) + b1, 0.0)
    logits_ref = jnp.dot(bf(h_ref), bf(w2).T,
                         preferred_element_type=jnp.float32) + b2
    ref = jax.nn.log_softmax(logits_ref, axis=1)

    assert out.shape == (N, C)
    assert bool(jnp.allclose(out, ref, atol=2e-3, rtol=2e-3)), "mismatch vs reference"
    print("KERNEL_OK")
</pallas_src>

<mosaic_0001>
module attributes {stable_mosaic.version = 11 : i64} {
  func.func @mlp_kernel(%arg0: i32, %arg1: memref<1x128xf32, #tpu.memory_space<vmem>>, %arg2: memref<128x256xbf16, #tpu.memory_space<vmem>>, %arg3: memref<1x256xf32, #tpu.memory_space<vmem>>, %arg4: memref<256x32xbf16, #tpu.memory_space<vmem>>, %arg5: memref<1x32xf32, #tpu.memory_space<vmem>>, %arg6: memref<1x32xf32, #tpu.memory_space<vmem>>) attributes {dimension_semantics = [#tpu.dimension_semantics<parallel>], iteration_bounds = array<i64: 1>, scalar_prefetch = 0 : i64, scratch_operands = 0 : i64, tpu.core_type = #tpu.core_type<tc>, window_params = [{transform_indices = @transform_0, window_bounds = array<i64: 1, 128>}, {pipeline_mode = #tpu.pipeline_mode<synchronous>, transform_indices = @transform_1, window_bounds = array<i64: 128, 256>}, {pipeline_mode = #tpu.pipeline_mode<synchronous>, transform_indices = @transform_2, window_bounds = array<i64: 1, 256>}, {pipeline_mode = #tpu.pipeline_mode<synchronous>, transform_indices = @transform_3, window_bounds = array<i64: 256, 32>}, {pipeline_mode = #tpu.pipeline_mode<synchronous>, transform_indices = @transform_4, window_bounds = array<i64: 1, 32>}, {transform_indices = @transform_5, window_bounds = array<i64: 1, 32>}]} {
    %c0 = arith.constant 0 : index
    %c0_0 = arith.constant 0 : index
    %0 = vector.load %arg1[%c0, %c0_0] : memref<1x128xf32, #tpu.memory_space<vmem>>, vector<1x128xf32>
    %1 = arith.truncf %0 : vector<1x128xf32> to vector<1x128xbf16>
    %c0_1 = arith.constant 0 : index
    %c0_2 = arith.constant 0 : index
    %2 = vector.load %arg2[%c0_1, %c0_2] : memref<128x256xbf16, #tpu.memory_space<vmem>>, vector<128x256xbf16>
    %cst = arith.constant dense<0.000000e+00> : vector<1x256xf32>
    %3 = tpu.matmul %1, %2, %cst {dimension_numbers = #tpu.dot_dimension_numbers<[1], [0], [0], [1], [0, 0, 1, 1], [], []>} : vector<1x128xbf16>, vector<128x256xbf16>, vector<1x256xf32> -> vector<1x256xf32>
    %c0_3 = arith.constant 0 : index
    %c0_4 = arith.constant 0 : index
    %4 = vector.load %arg3[%c0_3, %c0_4] : memref<1x256xf32, #tpu.memory_space<vmem>>, vector<1x256xf32>
    %5 = arith.addf %3, %4 : vector<1x256xf32>
    %cst_5 = arith.constant 0.000000e+00 : f32
    %6 = vector.broadcast %cst_5 : f32 to vector<1x256xf32>
    %7 = arith.maximumf %5, %6 : vector<1x256xf32>
    %8 = arith.truncf %7 : vector<1x256xf32> to vector<1x256xbf16>
    %c0_6 = arith.constant 0 : index
    %c0_7 = arith.constant 0 : index
    %9 = vector.load %arg4[%c0_6, %c0_7] : memref<256x32xbf16, #tpu.memory_space<vmem>>, vector<256x32xbf16>
    %cst_8 = arith.constant dense<0.000000e+00> : vector<1x32xf32>
    %10 = tpu.matmul %8, %9, %cst_8 {dimension_numbers = #tpu.dot_dimension_numbers<[1], [0], [0], [1], [0, 0, 1, 1], [], []>} : vector<1x256xbf16>, vector<256x32xbf16>, vector<1x32xf32> -> vector<1x32xf32>
    %c0_9 = arith.constant 0 : index
    %c0_10 = arith.constant 0 : index
    %11 = vector.load %arg5[%c0_9, %c0_10] : memref<1x32xf32, #tpu.memory_space<vmem>>, vector<1x32xf32>
    %12 = arith.addf %10, %11 : vector<1x32xf32>
    %13 = vector.extract_strided_slice %12 {offsets = [0, 0], sizes = [1, 4], strides = [1, 1]} : vector<1x32xf32> to vector<1x4xf32>
    %cst_11 = arith.constant dense<0xFF800000> : vector<1xf32>
    %14 = vector.multi_reduction <maximumf>, %13, %cst_11 [1] : vector<1x4xf32> to vector<1xf32>
    %15 = vector.shape_cast %14 : vector<1xf32> to vector<1x1xf32>
    %16 = vector.broadcast %15 : vector<1x1xf32> to vector<1x4xf32>
    %17 = arith.subf %13, %16 : vector<1x4xf32>
    %18 = math.exp %17 : vector<1x4xf32>
    %cst_12 = arith.constant dense<0.000000e+00> : vector<1xf32>
    %19 = vector.multi_reduction <add>, %18, %cst_12 [1] : vector<1x4xf32> to vector<1xf32>
    %20 = vector.shape_cast %19 : vector<1xf32> to vector<1x1xf32>
    %21 = math.log %20 : vector<1x1xf32>
    %22 = arith.addf %15, %21 : vector<1x1xf32>
    %23 = vector.broadcast %22 : vector<1x1xf32> to vector<1x4xf32>
    %24 = arith.subf %13, %23 : vector<1x4xf32>
    %25 = vector.extract_strided_slice %12 {offsets = [0, 4], sizes = [1, 4], strides = [1, 1]} : vector<1x32xf32> to vector<1x4xf32>
    %cst_13 = arith.constant dense<0xFF800000> : vector<1xf32>
    %26 = vector.multi_reduction <maximumf>, %25, %cst_13 [1] : vector<1x4xf32> to vector<1xf32>
    %27 = vector.shape_cast %26 : vector<1xf32> to vector<1x1xf32>
    %28 = vector.broadcast %27 : vector<1x1xf32> to vector<1x4xf32>
    %29 = arith.subf %25, %28 : vector<1x4xf32>
    %30 = math.exp %29 : vector<1x4xf32>
    %cst_14 = arith.constant dense<0.000000e+00> : vector<1xf32>
    %31 = vector.multi_reduction <add>, %30, %cst_14 [1] : vector<1x4xf32> to vector<1xf32>
    %32 = vector.shape_cast %31 : vector<1xf32> to vector<1x1xf32>
    %33 = math.log %32 : vector<1x1xf32>
    %34 = arith.addf %27, %33 : vector<1x1xf32>
    %35 = vector.broadcast %34 : vector<1x1xf32> to vector<1x4xf32>
    %36 = arith.subf %25, %35 : vector<1x4xf32>
    %37 = vector.extract_strided_slice %12 {offsets = [0, 8], sizes = [1, 4], strides = [1, 1]} : vector<1x32xf32> to vector<1x4xf32>
    %cst_15 = arith.constant dense<0xFF800000> : vector<1xf32>
    %38 = vector.multi_reduction <maximumf>, %37, %cst_15 [1] : vector<1x4xf32> to vector<1xf32>
    %39 = vector.shape_cast %38 : vector<1xf32> to vector<1x1xf32>
    %40 = vector.broadcast %39 : vector<1x1xf32> to vector<1x4xf32>
    %41 = arith.subf %37, %40 : vector<1x4xf32>
    %42 = math.exp %41 : vector<1x4xf32>
    %cst_16 = arith.constant dense<0.000000e+00> : vector<1xf32>
    %43 = vector.multi_reduction <add>, %42, %cst_16 [1] : vector<1x4xf32> to vector<1xf32>
    %44 = vector.shape_cast %43 : vector<1xf32> to vector<1x1xf32>
    %45 = math.log %44 : vector<1x1xf32>
    %46 = arith.addf %39, %45 : vector<1x1xf32>
    %47 = vector.broadcast %46 : vector<1x1xf32> to vector<1x4xf32>
    %48 = arith.subf %37, %47 : vector<1x4xf32>
    %49 = vector.extract_strided_slice %12 {offsets = [0, 12], sizes = [1, 4], strides = [1, 1]} : vector<1x32xf32> to vector<1x4xf32>
    %cst_17 = arith.constant dense<0xFF800000> : vector<1xf32>
    %50 = vector.multi_reduction <maximumf>, %49, %cst_17 [1] : vector<1x4xf32> to vector<1xf32>
    %51 = vector.shape_cast %50 : vector<1xf32> to vector<1x1xf32>
    %52 = vector.broadcast %51 : vector<1x1xf32> to vector<1x4xf32>
    %53 = arith.subf %49, %52 : vector<1x4xf32>
    %54 = math.exp %53 : vector<1x4xf32>
    %cst_18 = arith.constant dense<0.000000e+00> : vector<1xf32>
    %55 = vector.multi_reduction <add>, %54, %cst_18 [1] : vector<1x4xf32> to vector<1xf32>
    %56 = vector.shape_cast %55 : vector<1xf32> to vector<1x1xf32>
    %57 = math.log %56 : vector<1x1xf32>
    %58 = arith.addf %51, %57 : vector<1x1xf32>
    %59 = vector.broadcast %58 : vector<1x1xf32> to vector<1x4xf32>
    %60 = arith.subf %49, %59 : vector<1x4xf32>
    %61 = vector.extract_strided_slice %12 {offsets = [0, 16], sizes = [1, 4], strides = [1, 1]} : vector<1x32xf32> to vector<1x4xf32>
    %cst_19 = arith.constant dense<0xFF800000> : vector<1xf32>
    %62 = vector.multi_reduction <maximumf>, %61, %cst_19 [1] : vector<1x4xf32> to vector<1xf32>
    %63 = vector.shape_cast %62 : vector<1xf32> to vector<1x1xf32>
    %64 = vector.broadcast %63 : vector<1x1xf32> to vector<1x4xf32>
    %65 = arith.subf %61, %64 : vector<1x4xf32>
    %66 = math.exp %65 : vector<1x4xf32>
    %cst_20 = arith.constant dense<0.000000e+00> : vector<1xf32>
    %67 = vector.multi_reduction <add>, %66, %cst_20 [1] : vector<1x4xf32> to vector<1xf32>
    %68 = vector.shape_cast %67 : vector<1xf32> to vector<1x1xf32>
    %69 = math.log %68 : vector<1x1xf32>
    %70 = arith.addf %63, %69 : vector<1x1xf32>
    %71 = vector.broadcast %70 : vector<1x1xf32> to vector<1x4xf32>
    %72 = arith.subf %61, %71 : vector<1x4xf32>
    %73 = vector.extract_strided_slice %12 {offsets = [0, 20], sizes = [1, 4], strides = [1, 1]} : vector<1x32xf32> to vector<1x4xf32>
    %cst_21 = arith.constant dense<0xFF800000> : vector<1xf32>
    %74 = vector.multi_reduction <maximumf>, %73, %cst_21 [1] : vector<1x4xf32> to vector<1xf32>
    %75 = vector.shape_cast %74 : vector<1xf32> to vector<1x1xf32>
    %76 = vector.broadcast %75 : vector<1x1xf32> to vector<1x4xf32>
    %77 = arith.subf %73, %76 : vector<1x4xf32>
    %78 = math.exp %77 : vector<1x4xf32>
    %cst_22 = arith.constant dense<0.000000e+00> : vector<1xf32>
    %79 = vector.multi_reduction <add>, %78, %cst_22 [1] : vector<1x4xf32> to vector<1xf32>
    %80 = vector.shape_cast %79 : vector<1xf32> to vector<1x1xf32>
    %81 = math.log %80 : vector<1x1xf32>
    %82 = arith.addf %75, %81 : vector<1x1xf32>
    %83 = vector.broadcast %82 : vector<1x1xf32> to vector<1x4xf32>
    %84 = arith.subf %73, %83 : vector<1x4xf32>
    %85 = vector.extract_strided_slice %12 {offsets = [0, 24], sizes = [1, 4], strides = [1, 1]} : vector<1x32xf32> to vector<1x4xf32>
    %cst_23 = arith.constant dense<0xFF800000> : vector<1xf32>
    %86 = vector.multi_reduction <maximumf>, %85, %cst_23 [1] : vector<1x4xf32> to vector<1xf32>
    %87 = vector.shape_cast %86 : vector<1xf32> to vector<1x1xf32>
    %88 = vector.broadcast %87 : vector<1x1xf32> to vector<1x4xf32>
    %89 = arith.subf %85, %88 : vector<1x4xf32>
    %90 = math.exp %89 : vector<1x4xf32>
    %cst_24 = arith.constant dense<0.000000e+00> : vector<1xf32>
    %91 = vector.multi_reduction <add>, %90, %cst_24 [1] : vector<1x4xf32> to vector<1xf32>
    %92 = vector.shape_cast %91 : vector<1xf32> to vector<1x1xf32>
    %93 = math.log %92 : vector<1x1xf32>
    %94 = arith.addf %87, %93 : vector<1x1xf32>
    %95 = vector.broadcast %94 : vector<1x1xf32> to vector<1x4xf32>
    %96 = arith.subf %85, %95 : vector<1x4xf32>
    %97 = vector.extract_strided_slice %12 {offsets = [0, 28], sizes = [1, 4], strides = [1, 1]} : vector<1x32xf32> to vector<1x4xf32>
    %cst_25 = arith.constant dense<0xFF800000> : vector<1xf32>
    %98 = vector.multi_reduction <maximumf>, %97, %cst_25 [1] : vector<1x4xf32> to vector<1xf32>
    %99 = vector.shape_cast %98 : vector<1xf32> to vector<1x1xf32>
    %100 = vector.broadcast %99 : vector<1x1xf32> to vector<1x4xf32>
    %101 = arith.subf %97, %100 : vector<1x4xf32>
    %102 = math.exp %101 : vector<1x4xf32>
    %cst_26 = arith.constant dense<0.000000e+00> : vector<1xf32>
    %103 = vector.multi_reduction <add>, %102, %cst_26 [1] : vector<1x4xf32> to vector<1xf32>
    %104 = vector.shape_cast %103 : vector<1xf32> to vector<1x1xf32>
    %105 = math.log %104 : vector<1x1xf32>
    %106 = arith.addf %99, %105 : vector<1x1xf32>
    %107 = vector.broadcast %106 : vector<1x1xf32> to vector<1x4xf32>
    %108 = arith.subf %97, %107 : vector<1x4xf32>
    %109 = tpu.concatenate %24, %36, %48, %60, %72, %84, %96, %108 in 1 : vector<1x4xf32>, vector<1x4xf32>, vector<1x4xf32>, vector<1x4xf32>, vector<1x4xf32>, vector<1x4xf32>, vector<1x4xf32>, vector<1x4xf32> -> vector<1x32xf32>
    %c0_27 = arith.constant 0 : index
    %c0_28 = arith.constant 0 : index
    %110 = vector.load %arg6[%c0_27, %c0_28] : memref<1x32xf32, #tpu.memory_space<vmem>>, vector<1x32xf32>
    tpu.vector_store %arg6[%c0_27, %c0_28], %109 {strides = array<i32>} : memref<1x32xf32, #tpu.memory_space<vmem>>, vector<1x32xf32>,
    return
  }
  func.func @transform_0(%arg0: i32) -> (i32, i32) {
    %c0_i32 = arith.constant 0 : i32
    %c0_i32_0 = arith.constant 0 : i32
    return %arg0, %c0_i32 : i32, i32
  }
  func.func @transform_1(%arg0: i32) -> (i32, i32) {
    %c0_i32 = arith.constant 0 : i32
    %c0_i32_0 = arith.constant 0 : i32
    %c0_i32_1 = arith.constant 0 : i32
    return %c0_i32, %c0_i32_0 : i32, i32
  }
  func.func @transform_2(%arg0: i32) -> (i32, i32) {
    %c0_i32 = arith.constant 0 : i32
    %c0_i32_0 = arith.constant 0 : i32
    %c0_i32_1 = arith.constant 0 : i32
    return %c0_i32, %c0_i32_0 : i32, i32
  }
  func.func @transform_3(%arg0: i32) -> (i32, i32) {
    %c0_i32 = arith.constant 0 : i32
    %c0_i32_0 = arith.constant 0 : i32
    %c0_i32_1 = arith.constant 0 : i32
    return %c0_i32, %c0_i32_0 : i32, i32
  }
  func.func @transform_4(%arg0: i32) -> (i32, i32) {
    %c0_i32 = arith.constant 0 : i32
    %c0_i32_0 = arith.constant 0 : i32
    %c0_i32_1 = arith.constant 0 : i32
    return %c0_i32, %c0_i32_0 : i32, i32
  }
  func.func @transform_5(%arg0: i32) -> (i32, i32) {
    %c0_i32 = arith.constant 0 : i32
    %c0_i32_0 = arith.constant 0 : i32
    return %arg0, %c0_i32 : i32, i32
  }
}

</mosaic_0001>

<bundles_post_ra>
// kernel: tpu_custom_call.1
= control target key start
LH: loop header
LB: loop body
LE: loop exit
PB: predicated region body
PF: predicated region fallthrough
CT: control target
= control target key end

     0   :  { %v675_v2 = vmov 0   ;;  %s894_s0 = inlined_call_operand.vmem [shape: f32[1,128], index: 0, kind: input, shape index: {}]   ;;  %s895_s1 = inlined_call_operand.vmem [shape: bf16[128,256], index: 1, kind: input, shape index: {}]   ;;  %s896_s2 = inlined_call_operand.vmem [shape: f32[1,256], index: 2, kind: input, shape index: {}]   ;;  %s897_s3 = inlined_call_operand.vmem [shape: bf16[256,32], index: 3, kind: input, shape index: {}]   ;;  %s898_s4 = inlined_call_operand.vmem [shape: f32[1,32], index: 4, kind: input, shape index: {}]   ;;  %s899_s5 = inlined_call_operand.hbm [shape: f32[1,32], index: 5, kind: output, shape index: {}]  }
   0x1   :  { %v579_v0 = vld [vmem:[%s895_s1 + $0x4] ss:$8 sps:$4 sm:$0xff]   ;;  %v581_v1 = vld [vmem:[%s895_s1] ss:$8 sps:$4 sm:$0xff]   ;;  %164 = vmatprep.mubr.bf16.mxu0 %v675_v2  ;;  %v582_v3 = vld [vmem:[%s895_s1 + $0x14] ss:$8 sps:$4 sm:$0xff]  }
   0x2   :  { %132 = vmatprep.subr.bf16.mxu0 %v579_v0  ;;  %v584_v4 = vld [vmem:[%s895_s1 + $0x10] ss:$8 sps:$4 sm:$0xff]   ;;  %v585_v5 = vld [vmem:[%s895_s1 + $0x24] ss:$8 sps:$4 sm:$0xff]   ;;  %v587_v6 = vld [vmem:[%s895_s1 + $0x20] ss:$8 sps:$4 sm:$0xff]  }
   0x3   :  { %133 = vmatpush1.bf16.msra.mxu0 %v581_v1  ;;  %v588_v7 = vld [vmem:[%s895_s1 + $0x34] ss:$8 sps:$4 sm:$0xff]   ;;  %v590_v8 = vld [vmem:[%s895_s1 + $0x30] ss:$8 sps:$4 sm:$0xff]   ;;  %v591_v9 = vld [vmem:[%s895_s1 + $0x44] ss:$8 sps:$4 sm:$0xff]  }
   0x4   :  { %134 = vmatprep.subr.bf16.mxu0 %v582_v3  ;;  %v603_v10 = vld [vmem:[%s897_s3 + $0x40] sm:$0xff]   ;;  %v605_v13 = vld [vmem:[%s897_s3 + $0x48] sm:$0xff]   ;;  %v607_v15 = vld [vmem:[%s897_s3 + $0x50] sm:$0xff]  }
   0x5   :  { %v604_v11 = vld [vmem:[%s897_s3] sm:$0xff]   ;;  %548 = vmatprep.subr.bf16.mxu1 %v603_v10  ;;  %v606_v14 = vld [vmem:[%s897_s3 + $0x8] sm:$0xff]   ;;  %v594_v16 = vld [vmem:[%s895_s1 + $0x54] ss:$8 sps:$4 sm:$0xff]  }
   0x6   :  { %v593_v12 = vld [vmem:[%s895_s1 + $0x40] ss:$8 sps:$4 sm:$0xff]   ;;  %549 = vmatpush3.bf16.msra.mxu1 %v604_v11  ;;  %v596_v17 = vld [vmem:[%s895_s1 + $0x50] ss:$8 sps:$4 sm:$0xff]   ;;  %v597_v20 = vld [vmem:[%s895_s1 + $0x64] ss:$8 sps:$4 sm:$0xff]  }
   0x7   :  { %135 = vmatpush1.bf16.msra.mxu0 %v584_v4  ;;  %550 = vmatprep.subr.bf16.mxu1 %v605_v13  ;;  %v608_v18 = vld [vmem:[%s897_s3 + $0x10] sm:$0xff]   ;;  %v609_v19 = vld [vmem:[%s897_s3 + $0x58] sm:$0xff]   ;;  %v599_v21 = vld [vmem:[%s895_s1 + $0x60] ss:$8 sps:$4 sm:$0xff]  }
   0x8   :  { %136 = vmatprep.subr.bf16.mxu0 %v585_v5  ;;  %v600_v22 = vld [vmem:[%s895_s1 + $0x74] ss:$8 sps:$4 sm:$0xff]   ;;  %v611_v24 = vld [vmem:[%s897_s3 + $0x60] sm:$0xff]  }
   0x9   :  { %v610_v23 = vld [vmem:[%s897_s3 + $0x18] sm:$0xff]   ;;  %v612_v25 = vld [vmem:[%s897_s3 + $0x20] sm:$0xff]  }
   0xa   :  { %551 = vmatpush3.bf16.msra.mxu1 %v606_v14 }
   0xb   :  { %137 = vmatpush1.bf16.msra.mxu0 %v587_v6  ;;  %552 = vmatprep.subr.bf16.mxu1 %v607_v15 }
   0xc   :  { %138 = vmatprep.subr.bf16.mxu0 %v588_v7 }
   0xe   :  { %553 = vmatpush3.bf16.msra.mxu1 %v608_v18 }
   0xf   :  { %139 = vmatpush1.bf16.msra.mxu0 %v590_v8  ;;  %554 = vmatprep.subr.bf16.mxu1 %v609_v19 }
  0x10   :  { %140 = vmatprep.subr.bf16.mxu0 %v591_v9 }
  0x12   :  { %555 = vmatpush3.bf16.msra.mxu1 %v610_v23 }
  0x13   :  { %141 = vmatpush1.bf16.msra.mxu0 %v593_v12 }
  0x14   :  { %142 = vmatprep.subr.bf16.mxu0 %v594_v16 }
  0x17   :  { %143 = vmatpush1.bf16.msra.mxu0 %v596_v17 }
  0x18   :  { %144 = vmatprep.subr.bf16.mxu0 %v597_v20 }
  0x19   :  { %10 = vsyncpa [#allocation3], 0  ;;  %v602_v26 = vld [vmem:[%s895_s1 + $0x70] ss:$8 sps:$4 sm:$0xff]   ;;  %v22_v27 = vld [vmem:[%s894_s0] sm:$0x1]  ;;  %556 = vmatprep.subr.bf16.mxu1 %v611_v24  ;;  %v122_v35 = vlaneseq }
  0x1a   :  { %v613_v28 = vld [vmem:[%s897_s3 + $0x68] sm:$0xff]   ;;  %v23_v29 = vpack.c.bf16 %v22_v27, %v22_v27  ;;  %557 = vmatpush3.bf16.msra.mxu1 %v612_v25  ;;  %v615_v31 = vld [vmem:[%s897_s3 + $0x70] sm:$0xff]   ;;  %v617_v33 = vld [vmem:[%s897_s3 + $0x78] sm:$0xff]   ;;  %vm396_vm0 = vcmask 122976   ;;  %vm360_vm1 = vcmask 57376   ;;  %vm414_vm2 = vcmask 155776  }
  0x1b   :  { %145 = vmatpush1.bf16.msra.mxu0 %v599_v21  ;;  %v614_v30 = vld [vmem:[%s897_s3 + $0x28] sm:$0xff]   ;;  %558 = vmatprep.subr.bf16.mxu1 %v613_v28  ;;  %v616_v32 = vld [vmem:[%s897_s3 + $0x30] sm:$0xff]   ;;  %v618_v34 = vld [vmem:[%s897_s3 + $0x38] sm:$0xff]   ;;  %v123_v36 = vshrl.u32 %v122_v35, 7  ;;  %vm378_vm3 = vcmask 90176   ;;  %vm450_vm4 = vcmask 221376  }
  0x1c   :  { %146 = vmatprep.subr.bf16.mxu0 %v600_v22  ;;  %v40_v38 = vld [vmem:[%s896_s2] sm:$0x3]  ;;  %vm432_vm5 = vcmask 188576   ;;  %vm468_vm6 = vcmask 254176   ;;  %vm346_vm7 = vcmask 24576   ;;  %s676_s2 = smov 124  }
  0x1d   :  { %v124_v37 = vsub.s32 0, %v123_v36  ;;  %v128_v39 = vsub.s32 1, %v123_v36  ;;  %v209_v53 = vld [vmem:[%s898_s4] sm:$0x1]  ;;  %s677_s4 = smov 120   ;;  %s678_s10 = smov 116  }
  0x1e   :  { %559 = vmatpush3.bf16.msra.mxu1 %v614_v30  ;;  %s679_s11 = smov 112   ;;  %s680_s12 = smov 100   ;;  %vm486_vm8 = vcmask 31744   ;;  %vm488_vm9 = vcmask 64512   ;;  %vm490_vm10 = vcmask 97280   ;;  %vm492_vm11 = vcmask 130048  }
  0x1f   :  { %147 = vmatpush1.bf16.msra.mxu0 %v602_v26  ;;  %560 = vmatprep.subr.bf16.mxu1 %v615_v31  ;;  %v125_v40 = vrot.slane %v40_v38, %v124_v37  ;;  %v129_v41 = vrot.slane %v40_v38, %v128_v39  ;;  %s681_s13 = smov 108   ;;  %s682_s14 = smov 104   ;;  %vm494_vm12 = vcmask 162816   ;;  %vm496_vm13 = vcmask 195584  }
  0x20   :  { %s683_s15 = smov [#allocation2]   ;;  %vm498_vm14 = vcmask 228352   ;;  %vm500_vm15 = vcmask 253952  }
  0x21   :  { %s508_s16 = sshll.u32 %s683_s15, 4  ;;  %s509_s16 = int_to_ptr.vmem [resolvable:$true] %s508_s16 }
  0x22   :  { %165 = vmatmul.mubr.bf16.vlgmr.msra.gmra.mrb[0].mxu0 %v23_v29  ;;  %561 = vmatpush3.bf16.msra.mxu1 %v616_v32  ;;  %s651_s17 = scalar_lea.vmem %s509_s16, 16  ;;  %s655_s18 = scalar_lea.vmem %s509_s16, 32 }
  0x23   :  { %562 = vmatprep.subr.bf16.mxu1 %v617_v33  ;;  %p652_p0 = scmp.ne.s32.totalorder %s509_s16, %s651_s17  ;;  %p656_p1 = scmp.lt.s32.totalorder %s509_s16, %s509_s16 }
  0x24   :  { %p657_p2 = scmp.lt.s32.totalorder %s655_s18, %s651_s17 }
  0x26   :  { %563 = vmatpush3.bf16.msra.mxu1 %v618_v34  ;;  %p658_p3 = por %p657_p2, %p656_p1 }
  0x28   :  { %p659_p4 = pnand %p658_p3, %p652_p0 }
  0xf5   :  { %v166_v42 = vpop.f32.mrb[0].mxu0 }
  0xf6   :  { %v167_v43 = vadd.f32 %v166_v42, %v125_v40  ;;  %v168_v44 = vpop.f32.mrb[1].mxu0 }
  0xf7   :  { %v169_v45 = vadd.f32 %v168_v44, %v129_v41  ;;  %v170_v46 = vpop.f32.mrb[2].mxu0 }
  0xf8   :  { %v173_v47 = vmax.f32 %v167_v43, 0.0  ;;  %v171_v48 = vpop.f32.mrb[3].mxu0 }
  0xf9   :  { %v174_v49 = vmax.f32 %v169_v45, 0.0 }
  0xfa   :  { %v175_v51 = vpack.c.bf16 %v173_v47, %v173_v47 }
  0xfb   :  { %v176_v50 = vpack.c.bf16 %v174_v49, %v174_v49 }
  0xfd   :  { %338 = vmatprep.mubr.bf16.mxu1 %v176_v50 }
  0xfe   :  { %339 = vmatmul.mubr.bf16.vlgmr.msra.gmra.mrb[0].mxu1 %v175_v51 }
 0x1d1   :  { %v564_v52 = vpop.f32.mrb[0].mxu1 }
 0x1d2   :  { %v565_v54 = vpop.f32.mrb[1].mxu1 }
 0x1d3   :  { %v566_v55 = vadd.f32 %v565_v54, %v564_v52  ;;  %v567_v56 = vpop.f32.mrb[2].mxu1 }
 0x1d4   :  { %v568_v57 = vpop.f32.mrb[3].mxu1 }
 0x1d5   :  { %v819_v58 = vadd.f32 %v566_v55, %v209_v53 }
 0x1d7   :  { %v397_v59 = vsel %vm396_vm0, %v819_v58, -inf  ;;  %v361_v60 = vsel %vm360_vm1, %v819_v58, -inf  ;;  %v415_v61 = vsel %vm414_vm2, %v819_v58, -inf  ;;  %v379_v62 = vsel %vm378_vm3, %v819_v58, -inf }
 0x1d8   :  { %398 = vmax.xlane.f32.xlu1 %v397_v59  ;;  %362 = vmax.xlane.f32.xlu0 %v361_v60  ;;  %v451_v63 = vsel %vm450_vm4, %v819_v58, -inf  ;;  %v433_v0 = vsel %vm432_vm5, %v819_v58, -inf  ;;  %v469_v1 = vsel %vm468_vm6, %v819_v58, -inf  ;;  %v347_v2 = vsel %vm346_vm7, %v819_v58, -inf }
 0x1dc   :  { %416 = vmax.xlane.f32.xlu1 %v415_v61  ;;  %380 = vmax.xlane.f32.xlu0 %v379_v62 }
 0x1e0   :  { %452 = vmax.xlane.f32.xlu1 %v451_v63  ;;  %434 = vmax.xlane.f32.xlu0 %v433_v0 }
 0x1e4   :  { %470 = vmax.xlane.f32.xlu0 %v469_v1  ;;  %348 = vmax.xlane.f32.xlu1 %v347_v2 }
 0x265   :  { %v830_v3 = vpop.xlane.xlu1 %398  ;;  %v832_v4 = vpop.xlane.xlu0 %362 }
 0x266   :  { %v400_v5 = vsub.f32 %v819_v58, %v830_v3  ;;  %v364_v6 = vsub.f32 %v819_v58, %v832_v4 }
 0x268   :  { %v365_v7 = vmul.f32 1.442695, %v364_v6  ;;  %v401_v10 = vmul.f32 1.442695, %v400_v5 }
 0x269   :  { %v838_v8 = vpop.xlane.xlu1 %416  ;;  %v840_v9 = vpop.xlane.xlu0 %380 }
 0x26a   :  { %v382_v11 = vsub.f32 %v819_v58, %v840_v9  ;;  %619 = vpow2.f32 %v365_v7  ;;  %v418_v12 = vsub.f32 %v819_v58, %v838_v8 }
 0x26b   :  { %621 = vpow2.f32 %v401_v10 }
 0x26c   :  { %v383_v13 = vmul.f32 1.442695, %v382_v11  ;;  %v419_v15 = vmul.f32 1.442695, %v418_v12 }
 0x26d   :  { %v846_v14 = vpop.xlane.xlu0 %434  ;;  %v850_v17 = vpop.xlane.xlu1 %452 }
 0x26e   :  { %623 = vpow2.f32 %v383_v13  ;;  %v436_v16 = vsub.f32 %v819_v58, %v846_v14  ;;  %v454_v20 = vsub.f32 %v819_v58, %v850_v17 }
 0x26f   :  { %625 = vpow2.f32 %v419_v15 }
 0x270   :  { %v437_v21 = vmul.f32 1.442695, %v436_v16  ;;  %v455_v24 = vmul.f32 1.442695, %v454_v20 }
 0x271   :  { %v852_v18 = vpop.xlane.xlu0 %470  ;;  %v349_v31 = vpop.xlane.xlu1 %348 }
 0x272   :  { %v472_v19 = vsub.f32 %v819_v58, %v852_v18  ;;  %v350_v32 = vsub.f32 %v819_v58, %v349_v31 }
 0x274   :  { %v473_v22 = vmul.f32 1.442695, %v472_v19  ;;  %v620_v23 = vpop.eup %619  ;;  %v351_v33 = vmul.f32 1.442695, %v350_v32 }
 0x275   :  { %368 = vrot.lane.b32.xlu1 %v620_v23, %s676_s2  ;;  %v622_v25 = vpop.eup %621 }
 0x276   :  { %627 = vpow2.f32 %v473_v22 }
 0x277   :  { %629 = vpow2.f32 %v437_v21 }
 0x278   :  { %v624_v26 = vpop.eup %623  ;;  %631 = vpow2.f32 %v455_v24 }
 0x279   :  { %386 = vrot.lane.b32.xlu0 %v624_v26, %s677_s4  ;;  %404 = vrot.lane.b32.xlu1 %v622_v25, %s678_s10  ;;  %v626_v27 = vpop.eup %625  ;;  %633 = vpow2.f32 %v351_v33 }
 0x27d   :  { %422 = vrot.lane.b32.xlu1 %v626_v27, %s679_s11 }
 0x280   :  { %v628_v28 = vpop.eup %627 }
 0x281   :  { %v630_v29 = vpop.eup %629  ;;  %476 = vrot.lane.b32.xlu0 %v628_v28, %s680_s12 }
 0x282   :  { %440 = vrot.lane.b32.xlu1 %v630_v29, %s681_s13  ;;  %v632_v30 = vpop.eup %631 }
 0x283   :  { %v634_v34 = vpop.eup %633 }
 0x284   :  { %v353_v35 = vsel %vm346_vm7, %v634_v34, 0.0 }
 0x286   :  { %458 = vrot.lane.b32.xlu1 %v632_v30, %s682_s14 }
 0x2a0   :  { %354 = vadd.xlane.f32.xlu0 %v353_v35 }
 0x2e7   :  { %v369_v36 = vpop.permute.xlu1 %368 }
 0x2e8   :  { %v371_v37 = vsel %vm346_vm7, %v369_v36, 0.0 }
 0x2e9   :  { %372 = vadd.xlane.f32.xlu0 %v371_v37 }
 0x2eb   :  { %v387_v38 = vpop.permute.xlu0 %386  ;;  %v405_v39 = vpop.permute.xlu1 %404 }
 0x2ec   :  { %v389_v40 = vsel %vm346_vm7, %v387_v38, 0.0  ;;  %v407_v41 = vsel %vm346_vm7, %v405_v39, 0.0 }
 0x2ed   :  { %390 = vadd.xlane.f32.xlu1 %v389_v40  ;;  %408 = vadd.xlane.f32.xlu0 %v407_v41 }
 0x2ef   :  { %v423_v42 = vpop.permute.xlu1 %422 }
 0x2f0   :  { %v425_v43 = vsel %vm346_vm7, %v423_v42, 0.0 }
 0x2f1   :  { %426 = vadd.xlane.f32.xlu0 %v425_v43 }
 0x2f3   :  { %v477_v46 = vpop.permute.xlu0 %476 }
 0x2f4   :  { %v441_v44 = vpop.permute.xlu1 %440  ;;  %v479_v48 = vsel %vm346_vm7, %v477_v46, 0.0 }
 0x2f5   :  { %v443_v45 = vsel %vm346_vm7, %v441_v44, 0.0 }
 0x2f6   :  { %444 = vadd.xlane.f32.xlu0 %v443_v45 }
 0x2f8   :  { %v459_v47 = vpop.permute.xlu1 %458 }
 0x2f9   :  { %v461_v49 = vsel %vm346_vm7, %v459_v47, 0.0 }
 0x2fa   :  { %480 = vadd.xlane.f32.xlu0 %v479_v48  ;;  %462 = vadd.xlane.f32.xlu1 %v461_v49 }
 0x32d   :  { %v355_v50 = vpop.xlane.xlu0 %354 }
 0x376   :  { %v373_v51 = vpop.xlane.xlu0 %372 }
 0x377   :  { %635 = vlog2.f32 %v373_v51 }
 0x378   :  { %637 = vlog2.f32 %v355_v50 }
 0x37a   :  { %v409_v52 = vpop.xlane.xlu0 %408  ;;  %v391_v53 = vpop.xlane.xlu1 %390 }
 0x37b   :  { %639 = vlog2.f32 %v391_v53 }
 0x37c   :  { %641 = vlog2.f32 %v409_v52 }
 0x37e   :  { %v427_v54 = vpop.xlane.xlu0 %426 }
 0x37f   :  { %643 = vlog2.f32 %v427_v54 }
 0x381   :  { %v636_v56 = vpop.eup %635 }
 0x382   :  { %v638_v57 = vpop.eup %637  ;;  %v375_v60 = vmul.f32 0.6931472, %v636_v56 }
 0x383   :  { %v445_v55 = vpop.xlane.xlu0 %444  ;;  %v357_v1 = vmul.f32 0.6931472, %v638_v57 }
 0x384   :  { %645 = vlog2.f32 %v445_v55  ;;  %v376_v5 = vadd.f32 %v375_v60, %v832_v4 }
 0x385   :  { %v640_v59 = vpop.eup %639  ;;  %v358_v11 = vadd.f32 %v357_v1, %v349_v31 }
 0x386   :  { %v642_v63 = vpop.eup %641  ;;  %v393_v0 = vmul.f32 0.6931472, %v640_v59  ;;  %v377_v13 = vsub.f32 %v819_v58, %v376_v5 }
 0x387   :  { %v481_v61 = vpop.xlane.xlu0 %480  ;;  %v463_v62 = vpop.xlane.xlu1 %462  ;;  %v411_v6 = vmul.f32 0.6931472, %v642_v63  ;;  %v359_v21 = vsub.f32 %v819_v58, %v358_v11 }
 0x388   :  { %647 = vlog2.f32 %v481_v61  ;;  %v394_v7 = vadd.f32 %v393_v0, %v840_v9 }
 0x389   :  { %649 = vlog2.f32 %v463_v62  ;;  %v644_v2 = vpop.eup %643  ;;  %v412_v15 = vadd.f32 %v411_v6, %v830_v3  ;;  %v487_v23 = vsel %vm486_vm8, %v359_v21, %v377_v13 }
 0x38a   :  { %v429_v10 = vmul.f32 0.6931472, %v644_v2  ;;  %v395_v19 = vsub.f32 %v819_v58, %v394_v7 }
 0x38b   :  { %v413_v24 = vsub.f32 %v819_v58, %v412_v15 }
 0x38c   :  { %v430_v20 = vadd.f32 %v429_v10, %v838_v8  ;;  %v489_v26 = vsel %vm488_vm9, %v487_v23, %v395_v19 }
 0x38d   :  { %v491_v30 = vsel %vm490_vm10, %v489_v26, %v413_v24 }
 0x38e   :  { %v646_v12 = vpop.eup %645  ;;  %v431_v3 = vsub.f32 %v819_v58, %v430_v20 }
 0x38f   :  { %v447_v16 = vmul.f32 0.6931472, %v646_v12 }
 0x390   :  { %v493_v32 = vsel %vm492_vm11, %v491_v30, %v431_v3 }
 0x391   :  { %v448_v4 = vadd.f32 %v447_v16, %v846_v14 }
 0x392   :  { %v648_v22 = vpop.eup %647 }
 0x393   :  { %v650_v9 = vpop.eup %649  ;;  %v483_v25 = vmul.f32 0.6931472, %v648_v22  ;;  %v449_v28 = vsub.f32 %v819_v58, %v448_v4 }
 0x394   :  { %v465_v27 = vmul.f32 0.6931472, %v650_v9 }
 0x395   :  { %v484_v8 = vadd.f32 %v483_v25, %v852_v18  ;;  %v495_v33 = vsel %vm494_vm12, %v493_v32, %v449_v28 }
 0x396   :  { %v466_v29 = vadd.f32 %v465_v27, %v850_v17 }
 0x397   :  { %v485_v14 = vsub.f32 %v819_v58, %v484_v8 }
 0x398   :  { %v467_v31 = vsub.f32 %v819_v58, %v466_v29 }
 0x39a   :  { %v497_v34 = vsel %vm496_vm13, %v495_v33, %v467_v31 }
 0x39b   :  { %v499_v35 = vsel %vm498_vm14, %v497_v34, %v485_v14 }
 0x39c   :  { %501 = vst.msk [vmem:[#allocation2] sm:$0x1] %vm500_vm15, %v499_v35 }
 0x39d   :  { %662 = shalt.err (!%p659_p4)
}
 0x39e   :  { %s663_s21 = scalar_lea.hbm %s899_s5, 16 }
 0x39f   :  { %p664_p5 = scmp.ne.s32.totalorder %s899_s5, %s663_s21  ;;  %p667_p6 = scmp.lt.u32.totalorder %s663_s21, %s899_s5 }
 0x3a1   :  { %p669_p7 = pnand %p667_p6, %p664_p5 }
 0x3a3   :  { %672 = shalt.err (!%p669_p7)
}
 0x3a4   :  { %511 = dma.vmem_to_hbm [thread:$0]  %s509_s16, 16, %s899_s5, [#allocation3]  }
 0x3a5   :  { %673 = dma.done.wait [#allocation3], 16  }
 0x3a6   :  { %674 = vsyncadd [#allocation3], 4294967280 }
 0x3a7   :  { %515 = vsyncpa [#allocation3], 1 }

</bundles_post_ra>
